<compile_context>
chip_gen: v7x
topology: tpu7x:2x2x1
jax: 0.10.0
libtpu: 0.0.40
codegen_flags: <defaults>
</compile_context>

<pallas_src>
import numpy as np

import jax
import jax.numpy as jnp
from jax.experimental import pallas as pl
from jax.experimental.pallas import tpu as pltpu


# ----------------------------- Pallas kernel --------------------------------
def _relpos_kernel(q_ref, wall_ref, mask_ref, sel_ref, o_ref):
    # q_ref    : (G*N/P, P*D)  packed queries (P queries per row)
    # wall_ref : (P*D,  P*J)   block-diag expanded rel embeddings, J = h*h + w*w
    # mask_ref : (G*N/P, P*J)  per-query one-hot selection of its (qr, qc) diagonal
    # sel_ref  : (P*J,  P*N)   0/1 broadcast+add matrix over the N keys
    # o_ref    : (G*N/P, P*N)  P query rows of the (N, N) logits per row (lane-dense)
    ghw = jnp.dot(q_ref[...], wall_ref[...], preferred_element_type=jnp.float32)
    masked = ghw * mask_ref[...]                       # single lane-dense VPU pass
    out = jnp.dot(masked, sel_ref[...], preferred_element_type=jnp.float32)
    o_ref[...] = out.astype(o_ref.dtype)


# ------------------------------- wrapper -------------------------------------
def rel_pos_emb(q, rel_height, rel_width, fmap_h, fmap_w):
    """q: (B, heads, N, D) with N = fmap_h * fmap_w. Returns (B, heads, N, N)."""
    B, heads, N, D = q.shape
    h, w = fmap_h, fmap_w
    assert N == h * w
    assert rel_height.shape == (2 * h - 1, D)
    assert rel_width.shape == (2 * w - 1, D)

    bh = B * heads
    jh, jw = h * h, w * w
    J = jh + jw

    # Pack P queries per output row so the output block's last dim is >= 128 lanes.
    pack = 1
    while pack * N < 128 and N % (pack * 2) == 0:
        pack *= 2

    # Batch G (batch, head) pairs per grid step; keep >= 2 steps for v7x's two TCs.
    g_block = 1
    if bh >= 2:
        for cand in (8, 4, 2):
            if bh % cand == 0 and bh // cand >= 2:
                g_block = cand
                break

    rows_total = bh * N // pack
    rows_blk = g_block * N // pack
    grid = (bh // g_block,)

    # ------------------- host-side constant tables (tiny) -------------------
    # Expanded rel-embedding matrix W_all (D, J):
    #   height block, column j = kr*h + qr' -> rel_height[kr - qr' + h - 1]
    #   width  block, column j = qc'*w + kc -> rel_width [kc - qc' + w - 1]
    idx_h = (np.arange(h)[:, None] - np.arange(h)[None, :] + h - 1).reshape(-1)
    idx_w = (np.arange(w)[None, :] - np.arange(w)[:, None] + w - 1).reshape(-1)
    w_h = jnp.take(rel_height.astype(jnp.float32), jnp.asarray(idx_h), axis=0)  # (h*h, D)
    w_w = jnp.take(rel_width.astype(jnp.float32), jnp.asarray(idx_w), axis=0)   # (w*w, D)
    w_all = jnp.concatenate([w_h, w_w], axis=0).T                               # (D, J)

    # Per-query one-hot mask (query p = qr*w + qc): keep only qr' == qr / qc' == qc.
    q_rows = np.arange(N) // w
    q_cols = np.arange(N) % w
    mask_h = np.broadcast_to(
        np.arange(h)[None, None, :] == q_rows[:, None, None], (N, h, h)).reshape(N, jh)
    mask_w = np.broadcast_to(
        np.arange(w)[None, :, None] == q_cols[:, None, None], (N, w, w)).reshape(N, jw)
    mask = np.concatenate([mask_h, mask_w], axis=1).astype(np.float32)          # (N, J)

    # 0/1 broadcast+add matrix over keys k = kr*w + kc:
    #   height column (kr-major) contributes to all keys with that kr,
    #   width  column (kc within qc'-major) contributes to all keys with that kc.
    k_rows = np.arange(N) // w
    k_cols = np.arange(N) % w
    sel_h = (np.repeat(np.arange(h), h)[:, None] == k_rows[None, :])            # (h*h, N)
    sel_w = (np.tile(np.arange(w), w)[:, None] == k_cols[None, :])              # (w*w, N)
    sel = np.concatenate([sel_h, sel_w], axis=0).astype(np.float32)             # (J, N)

    # Pack P queries per row: block-diagonal expansion of both matmul operands,
    # row-major fold of the mask, pre-tiled over the G bh-pairs of one block.
    eye_p = np.eye(pack, dtype=np.float32)
    w_all_p = jnp.kron(jnp.asarray(eye_p), w_all)                               # (P*D, P*J)
    sel_p = jnp.asarray(np.kron(eye_p, sel))                                    # (P*J, P*N)
    mask_tiled = jnp.asarray(
        np.tile(mask.reshape(N // pack, pack * J), (g_block, 1)))               # (rows_blk, P*J)

    # Glue: fold (B, heads, N) into rows, P queries per row (free row-major reshape).
    qf = q.astype(jnp.float32).reshape(rows_total, pack * D)

    itemsize = 4
    flops = (2 * rows_total * (pack * D) * (pack * J)
             + 2 * rows_total * (pack * J) * (pack * N))
    bytes_accessed = itemsize * (qf.size + rows_total * pack * N
                                 + w_all_p.size + mask_tiled.size + sel_p.size)

    out = pl.pallas_call(
        _relpos_kernel,
        out_shape=jax.ShapeDtypeStruct((rows_total, pack * N), q.dtype),
        grid_spec=pltpu.PrefetchScalarGridSpec(
            num_scalar_prefetch=0,
            grid=grid,
            in_specs=[
                pl.BlockSpec((rows_blk, pack * D), lambda i: (i, 0)),
                pl.BlockSpec((pack * D, pack * J), lambda i: (0, 0)),
                pl.BlockSpec((rows_blk, pack * J), lambda i: (0, 0)),
                pl.BlockSpec((pack * J, pack * N), lambda i: (0, 0)),
            ],
            out_specs=pl.BlockSpec((rows_blk, pack * N), lambda i: (i, 0)),
        ),
        compiler_params=pltpu.CompilerParams(dimension_semantics=("parallel",)),
        cost_estimate=pl.CostEstimate(
            flops=flops, transcendentals=0, bytes_accessed=bytes_accessed),
    )(qf, w_all_p, mask_tiled, sel_p)

    return out.reshape(B, heads, N, N)


# --------------------- pure-JAX reference (for validation) ------------------
def _rel_to_abs_ref(x):
    b, hh, l, _ = x.shape
    x = jnp.concatenate([x, jnp.zeros((b, hh, l, 1), x.dtype)], axis=3)
    flat = x.reshape(b, hh, l * 2 * l)
    flat = jnp.concatenate([flat, jnp.zeros((b, hh, l - 1), x.dtype)], axis=2)
    final = flat.reshape(b, hh, l + 1, 2 * l - 1)
    return final[:, :, :l, l - 1:]


def _relative_logits_1d_ref(q, rel_k):
    b, heads, hh, w, d = q.shape
    logits = jnp.einsum('bhxyd,rd->bhxyr', q, rel_k)
    logits = logits.reshape(b, heads * hh, w, 2 * w - 1)
    logits = _rel_to_abs_ref(logits)
    logits = logits.reshape(b, heads, hh, w, w)
    logits = jnp.broadcast_to(logits[:, :, :, None, :, :], (b, heads, hh, hh, w, w))
    return logits


def rel_pos_emb_ref(q, rel_height, rel_width, fmap_h, fmap_w):
    b, heads, n, d = q.shape
    q5 = q.reshape(b, heads, fmap_h, fmap_w, d)
    rlw = _relative_logits_1d_ref(q5, rel_width)                   # (b,H,x,i,y,j)
    rlw = rlw.transpose(0, 1, 2, 4, 3, 5).reshape(b, heads, n, n)  # (x y)(i j)
    qT = q5.transpose(0, 1, 3, 2, 4)                               # b h y x d
    rlh = _relative_logits_1d_ref(qT, rel_height)                  # (b,H,x,i,y,j)
    rlh = rlh.transpose(0, 1, 4, 2, 5, 3).reshape(b, heads, n, n)  # (y x)(j i)
    return rlw + rlh


# ---------------------------------- main -------------------------------------
if __name__ == "__main__":
    # Module config (small, consistent with the PyTorch __init__/forward).
    fmap_size = 8          # -> h = w = 8, N = 64
    dim_head = 32
    batch, heads = 2, 4
    h = w = fmap_size
    N = h * w

    key = jax.random.PRNGKey(0)
    kq, kh, kw = jax.random.split(key, 3)
    scale = dim_head ** -0.5
    # Deterministic "parameters" (torch.randn(height*2-1, dim_head) * scale).
    rel_height = jax.random.normal(kh, (2 * h - 1, dim_head), jnp.float32) * scale
    rel_width = jax.random.normal(kw, (2 * w - 1, dim_head), jnp.float32) * scale
    # Input q: (b, heads, h*w, dim_head)
    q = jax.random.normal(kq, (batch, heads, N, dim_head), jnp.float32)

    out = jax.block_until_ready(rel_pos_emb(q, rel_height, rel_width, h, w))
    ref = jax.block_until_ready(rel_pos_emb_ref(q, rel_height, rel_width, h, w))
    np.testing.assert_allclose(np.asarray(out), np.asarray(ref), rtol=1e-5, atol=1e-5)

    print("KERNEL_OK")
</pallas_src>

<mosaic_0001>
module attributes {stable_mosaic.version = 11 : i64} {
  func.func @_relpos_kernel(%arg0: i32, %arg1: memref<128x64xf32, #tpu.memory_space<vmem>>, %arg2: memref<64x256xf32, #tpu.memory_space<vmem>>, %arg3: memref<128x256xf32, #tpu.memory_space<vmem>>, %arg4: memref<256x128xf32, #tpu.memory_space<vmem>>, %arg5: memref<128x128xf32, #tpu.memory_space<vmem>>) attributes {dimension_semantics = [#tpu.dimension_semantics<parallel>], iteration_bounds = array<i64: 2>, scalar_prefetch = 0 : i64, scratch_operands = 0 : i64, tpu.core_type = #tpu.core_type<tc>, window_params = [{transform_indices = @transform_0, window_bounds = array<i64: 128, 64>}, {pipeline_mode = #tpu.pipeline_mode<synchronous>, transform_indices = @transform_1, window_bounds = array<i64: 64, 256>}, {pipeline_mode = #tpu.pipeline_mode<synchronous>, transform_indices = @transform_2, window_bounds = array<i64: 128, 256>}, {pipeline_mode = #tpu.pipeline_mode<synchronous>, transform_indices = @transform_3, window_bounds = array<i64: 256, 128>}, {transform_indices = @transform_4, window_bounds = array<i64: 128, 128>}]} {
    %c0 = arith.constant 0 : index
    %c0_0 = arith.constant 0 : index
    %0 = vector.load %arg1[%c0, %c0_0] : memref<128x64xf32, #tpu.memory_space<vmem>>, vector<128x64xf32>
    %c0_1 = arith.constant 0 : index
    %c0_2 = arith.constant 0 : index
    %1 = vector.load %arg2[%c0_1, %c0_2] : memref<64x256xf32, #tpu.memory_space<vmem>>, vector<64x256xf32>
    %cst = arith.constant dense<0.000000e+00> : vector<128x256xf32>
    %2 = tpu.matmul %0, %1, %cst {dimension_numbers = #tpu.dot_dimension_numbers<[1], [0], [0], [1], [0, 0, 1, 1], [], []>} : vector<128x64xf32>, vector<64x256xf32>, vector<128x256xf32> -> vector<128x256xf32>
    %c0_3 = arith.constant 0 : index
    %c0_4 = arith.constant 0 : index
    %3 = vector.load %arg3[%c0_3, %c0_4] : memref<128x256xf32, #tpu.memory_space<vmem>>, vector<128x256xf32>
    %4 = arith.mulf %2, %3 : vector<128x256xf32>
    %c0_5 = arith.constant 0 : index
    %c0_6 = arith.constant 0 : index
    %5 = vector.load %arg4[%c0_5, %c0_6] : memref<256x128xf32, #tpu.memory_space<vmem>>, vector<256x128xf32>
    %cst_7 = arith.constant dense<0.000000e+00> : vector<128x128xf32>
    %6 = tpu.matmul %4, %5, %cst_7 {dimension_numbers = #tpu.dot_dimension_numbers<[1], [0], [0], [1], [0, 0, 1, 1], [], []>} : vector<128x256xf32>, vector<256x128xf32>, vector<128x128xf32> -> vector<128x128xf32>
    %c0_8 = arith.constant 0 : index
    %c0_9 = arith.constant 0 : index
    %7 = vector.load %arg5[%c0_8, %c0_9] : memref<128x128xf32, #tpu.memory_space<vmem>>, vector<128x128xf32>
    tpu.vector_store %arg5[%c0_8, %c0_9], %6 {strides = array<i32>} : memref<128x128xf32, #tpu.memory_space<vmem>>, vector<128x128xf32>,
    return
  }
  func.func @transform_0(%arg0: i32) -> (i32, i32) {
    %c0_i32 = arith.constant 0 : i32
    %c0_i32_0 = arith.constant 0 : i32
    return %arg0, %c0_i32 : i32, i32
  }
  func.func @transform_1(%arg0: i32) -> (i32, i32) {
    %c0_i32 = arith.constant 0 : i32
    %c0_i32_0 = arith.constant 0 : i32
    %c0_i32_1 = arith.constant 0 : i32
    return %c0_i32, %c0_i32_0 : i32, i32
  }
  func.func @transform_2(%arg0: i32) -> (i32, i32) {
    %c0_i32 = arith.constant 0 : i32
    %c0_i32_0 = arith.constant 0 : i32
    %c0_i32_1 = arith.constant 0 : i32
    return %c0_i32, %c0_i32_0 : i32, i32
  }
  func.func @transform_3(%arg0: i32) -> (i32, i32) {
    %c0_i32 = arith.constant 0 : i32
    %c0_i32_0 = arith.constant 0 : i32
    %c0_i32_1 = arith.constant 0 : i32
    return %c0_i32, %c0_i32_0 : i32, i32
  }
  func.func @transform_4(%arg0: i32) -> (i32, i32) {
    %c0_i32 = arith.constant 0 : i32
    %c0_i32_0 = arith.constant 0 : i32
    return %arg0, %c0_i32 : i32, i32
  }
}

</mosaic_0001>

<bundles_post_ra>
// kernel: tpu_custom_call.1
= control target key start
LH: loop header
LB: loop body
LE: loop exit
PB: predicated region body
PF: predicated region fallthrough
CT: control target
= control target key end

     0   :  { %9 = vsyncpa [#allocation3], 0  ;;  %s1513_s0 = inlined_call_operand.vmem [shape: f32[256,64], index: 0, kind: input, shape index: {}]   ;;  %s1514_s1 = inlined_call_operand.vmem [shape: f32[64,256], index: 1, kind: input, shape index: {}]   ;;  %s1515_s2 = inlined_call_operand.vmem [shape: f32[128,256], index: 2, kind: input, shape index: {}]   ;;  %s1516_s3 = inlined_call_operand.hbm [shape: f32[256,128], index: 3, kind: input, shape index: {}]   ;;  %s1517_s4 = inlined_call_operand.hbm [shape: f32[256,128], index: 4, kind: output, shape index: {}]  }
   0x1   :  { %10 = vsyncpa [#allocation4], 0 }
   0x2   :  { %12 = vsyncpa [#allocation4 + $0x1], 0  ;;  %s1159_s15 = smov 0   ;;  %s1161_s16 = smov 0  }
   0x3   :  { %s1163_s17 = smov 0   ;;  %s1165_s18 = smov 0  }
   0x4 LB: > { %s1180_s19 = sadd.s32 4294967295, %s1125_s18   ;;  %s801_s20 = sadd.s32 4294967294, %s1125_s18   ;;  %s1125_s18 = sphi %s1165_s18, %s1533_s18   ;;  %s1121_s17 = sphi %s1163_s17, %s1532_s17   ;;  %s1117_s16 = sphi %s1161_s16, %s1531_s16   ;;  %s1113_s15 = sphi %s1159_s15, %s1530_s15  }
   0x5   : > { %s1184_s21 = sadd.s32 1, %s1125_s18   ;;  %s114_s22 = sadd.s32 1, %s1121_s17 }
   0x6   : > { %s111_s23 = ssub.s32 %s1125_s18, %s1184_s21  ;;  %p124_p0 = scmp.ne.s32.totalorder %s1121_s17, %s1117_s16 }
   0x7   : > { %p112_p1 = scmp.eq.s32.totalorder %s111_s23, 0  ;;  %p125_p2 = scmp.eq.s32.totalorder %s1180_s19, 1 }
   0x8   : > { %p130_p3 = scmp.ne.s32.totalorder %s1117_s16, %s1113_s15  ;;  %p131_p4 = scmp.eq.s32.totalorder %s801_s20, 1 }
   0x9   : > { %s1195_s24 = scalar_select %p112_p1, %s1121_s17, %s114_s22  }
   0xa   : > { %p1197_p5 = por %p125_p2, %p124_p0  ;;  %p1201_p6 = por %p131_p4, %p130_p3 }
   0xb   : > { %p802_p7 = scmp.ge.s32.totalorder %s1125_s18, 1  ;;  %p138_p8 = scmp.lt.s32.totalorder %s1125_s18, 3 }
   0xc   : > { %s1521_s25 = scalar_select %p1197_p5, 1, 0 }
   0xd   : > { %s1522_s26 = scalar_select %p1201_p6, 1, 0 }
   0xe   : > { %p1518_p9 = scmp.eq.s32.totalorder %s1180_s19, 0  ;;  %p1208_p10 = pnand %p802_p7, %p138_p8 }
   0xf   : > { %s1127_s28 = smov [#allocation2]   ;;  %s1031_s7 = scalar_lea.hbm %s1516_s3, 4096 }
  0x10   : > { %s1523_s27 = scalar_select %p1208_p10, 1, 0 }
  0x11   : > { %s156_s29 = sshll.u32 %s1127_s28, 4  ;;  %p982_p11 = pneg %p1208_p10  ;;  %s157_s29 = int_to_ptr.vmem [resolvable:$true] %s156_s29 }
  0x12   : > { %p1032_p13 = scmp.ne.s32.totalorder %s1516_s3, %s1031_s7  ;;  %p1038_p3 = scmp.lt.u32.totalorder %s1031_s7, %s1516_s3 }
  0x13   : > { %p1216_p12 = pnand %p1518_p9, %p982_p11 }
  0x15   : > { %p1033_p0 = pneg %p1216_p12 }
  0x17   : > { %p1034_p1 = pnand %p1033_p0, %p1032_p13 }
  0x19   : > { %p1035_p2 = pneg %p1034_p1 }
  0x1b   : > { %p1040_p4 = pnand %p1038_p3, %p1035_p2 }
  0x1d   : > { %1043 = shalt.err (!%p1040_p4)
}
  0x1e   : > { %s1044_s12 = scalar_lea.vmem %s157_s29, 4096  ;;  %p1052_p9 = scmp.lt.s32.totalorder %s157_s29, %s157_s29 }
  0x1f   : > { %p1045_p7 = scmp.ne.s32.totalorder %s157_s29, %s1044_s12  ;;  %p1053_p6 = scmp.lt.s32.totalorder %s1044_s12, %s1044_s12 }
  0x21   : > { %p1047_p8 = pnand %p1045_p7, %p1033_p0  ;;  %p1054_p5 = por %p1053_p6, %p1052_p9 }
  0x23   : > { %p1048_p11 = pneg %p1047_p8 }
  0x25   : > { %p1055_p10 = pnand %p1054_p5, %p1048_p11 }
  0x27   : > { %1058 = shalt.err (!%p1055_p10)
}
  0x28   : > { %s1128_s13 = smov 128   ;;  %s1129_s14 = smov 8  }
  0x29   : > { %985 = dma.hbm_to_vmem [thread:$0]  (!%p1216_p12), %s1516_s3, 4096, %s157_s29, [#allocation3], %s1128_s13, %s1128_s13, %s1129_s14  }
  0x2a   : > { %p1525_p13 = scmp.ne.s32.totalorder %s1523_s27, 0 }
  0x2b   : > { %p1526_p1 = scmp.eq.s32.totalorder (!%p1525_p13), %s1180_s19, 0 }
  0x2c   : > { %181 = sbr.rel (%p1525_p13) target bundleno = 577 (0x241), region = 36 }
  0x33   : > { %1104 = dma.done.wait (%p1526_p1), [#allocation3], 4096   ;;  %p1527_p0 = pmov %p1526_p1 }
  0x34   : > { %v1130_v0 = vmov 0.0   ;;  %s808_s23 = sshll.u32 %s1180_s19, 4  ;;  %v231_v1 = vld [vmem:[%s1514_s1 + $0x8] sm:$0xff]  ;;  %v233_v2 = vld [vmem:[%s1514_s1 + $0x18] sm:$0xff]  ;;  %v230_v3 = vld [vmem:[%s1514_s1] sm:$0xff]  ;;  %vm246_vm0 = vcmask 523264  }
  0x35   : > { %1106 = vsyncadd (%p1527_p0), [#allocation3], 4294963200  ;;  %359 = vmatprep.mubr.f32.mxu0 %v1130_v0  ;;  %v912_v4 = vpack.c.bf16 %v233_v2, %v231_v1  ;;  %v232_v5 = vld [vmem:[%s1514_s1 + $0x10] sm:$0xff]  ;;  %v235_v6 = vld [vmem:[%s1514_s1 + $0x28] sm:$0xff]  ;;  %p208_p5 = scmp.lt.s32.totalorder %s808_s23, 31  ;;  %p1528_p9 = scmp.ne.s32.totalorder %s1521_s25, 0 }
  0x36   : > { %v237_v7 = vld [vmem:[%s1514_s1 + $0x38] sm:$0xff]  ;;  %v914_v8 = vpack.c.bf16 %v232_v5, %v230_v3  ;;  %v234_v10 = vld [vmem:[%s1514_s1 + $0x20] sm:$0xff]  ;;  %v236_v11 = vld [vmem:[%s1514_s1 + $0x30] sm:$0xff]  ;;  %s1131_s9 = smov [#allocation5]  }
  0x37   : > { %v916_v9 = vpack.c.bf16 %v237_v7, %v235_v6  ;;  %v239_v12 = vld [vmem:[%s1514_s1 + $0x48] sm:$0xff]  ;;  %913 = vmatprep.subr.bf16.mxu0 %v912_v4  ;;  %v241_v13 = vld [vmem:[%s1514_s1 + $0x58] sm:$0xff]  ;;  %v918_v14 = vpack.c.bf16 %v236_v11, %v234_v10  ;;  %v238_v16 = vld [vmem:[%s1514_s1 + $0x40] sm:$0xff]  ;;  %s1535_s23 = smov (!%p208_p5, %s808_s23), 31  ;;  %s1063_s10 = sshll.u32 %s1131_s9, 4  ;;  %s1064_s10 = int_to_ptr.vmem [resolvable:$false] %s1063_s10 }
  0x38   : > { %915 = vmatpush1.bf16.msra.mxu0 %v914_v8  ;;  %v920_v15 = vpack.c.bf16 %v241_v13, %v239_v12  ;;  %v240_v17 = vld [vmem:[%s1514_s1 + $0x50] sm:$0xff]  ;;  %v243_v18 = vld [vmem:[%s1514_s1 + $0x68] sm:$0xff]  ;;  %v245_v19 = vld [vmem:[%s1514_s1 + $0x78] sm:$0xff]  ;;  %s809_s28 = sshll.u32 %s1535_s23, 3  ;;  %s1065_s11 = scalar_lea.vmem %s1064_s10, 4096 }
  0x39   : > { %917 = vmatprep.subr.bf16.mxu0 %v916_v9  ;;  %v922_v20 = vpack.c.bf16 %v240_v17, %v238_v16  ;;  %v924_v21 = vpack.c.bf16 %v245_v19, %v243_v18  ;;  %v242_v22 = vld [vmem:[%s1514_s1 + $0x60] sm:$0xff]  ;;  %v244_v23 = vld [vmem:[%s1514_s1 + $0x70] sm:$0xff]  ;;  %v537_v25 = vld [vmem:[#allocation2 + $0x88] sm:$0xff]  ;;  %s1295_s29 = scalar_lea.vmem %s1513_s0, %s809_s28  ;;  %s204_s28 = sand.u32 1, %s1117_s16  }
  0x3a   : > { %v536_v24 = vld [vmem:[#allocation2 + $0x80] sm:$0xff]  ;;  %v521_v27 = vld [vmem:[#allocation2 + $0x8] sm:$0xff]  ;;  %v926_v28 = vpack.c.bf16 %v244_v23, %v242_v22  ;;  %v538_v30 = vld [vmem:[#allocation2 + $0x90] sm:$0xff]  ;;  %s807_s30 = sshll.u32 %s204_s28, 7  ;;  %s1472_s8 = scalar_lea.sflag [#allocation4], %s204_s28 }
  0x3b   : > { %v520_v26 = vld [vmem:[#allocation2] sm:$0xff]  ;;  %v928_v29 = vpack.c.bf16 %v537_v25, %v536_v24  ;;  %v539_v31 = vld [vmem:[#allocation2 + $0x98] sm:$0xff]  ;;  %v522_v34 = vld [vmem:[#allocation2 + $0x10] sm:$0xff]  ;;  %s1443_s5 = scalar_lea.vmem [#allocation5], %s807_s30 }
  0x3c   : > { %919 = vmatpush1.bf16.msra.mxu0 %v918_v14  ;;  %v930_v32 = vpack.c.bf16 %v521_v27, %v520_v26  ;;  %v932_v33 = vpack.c.bf16 %v539_v31, %v538_v30  ;;  %v523_v35 = vld [vmem:[#allocation2 + $0x18] sm:$0xff]  ;;  %v214_v36 = vld [vmem:[%s1295_s29] sm:$0xff]  ;;  %v541_v38 = vld [vmem:[#allocation2 + $0xa8] sm:$0xff]  ;;  %s727_s23 = sshll.u32 %s1443_s5, 4  ;;  %s1467_s23 = int_to_ptr.vmem [resolvable:$true] %s727_s23 }
  0x3d   : > { %921 = vmatprep.subr.bf16.mxu0 %v920_v15  ;;  %960 = vmatprep.subr.bf16.mxu1 %v928_v29  ;;  %v540_v37 = vld [vmem:[#allocation2 + $0xa0] sm:$0xff]  ;;  %v934_v39 = vpack.c.bf16 %v523_v35, %v522_v34  ;;  %v525_v41 = vld [vmem:[#allocation2 + $0x28] sm:$0xff]  ;;  %v542_v44 = vld [vmem:[#allocation2 + $0xb0] sm:$0xff]  ;;  %p1066_p2 = scmp.lt.s32.totalorder %s1467_s23, %s1064_s10 }
  0x3e   : > { %968 = vmatpush3.bf16.msra.mxu1 %v930_v32  ;;  %v524_v40 = vld [vmem:[#allocation2 + $0x20] sm:$0xff]  ;;  %v936_v42 = vpack.c.bf16 %v541_v38, %v540_v37  ;;  %v215_v43 = vld [vmem:[%s1295_s29 + $0x8] sm:$0xff]  ;;  %v543_v45 = vld [vmem:[#allocation2 + $0xb8] sm:$0xff] }
  0x3f   : > { %961 = vmatprep.subr.bf16.mxu1 %v932_v33  ;;  %v938_v46 = vpack.c.bf16 %v525_v41, %v524_v40  ;;  %v526_v47 = vld [vmem:[#allocation2 + $0x30] sm:$0xff]  ;;  %v527_v48 = vld [vmem:[#allocation2 + $0x38] sm:$0xff]  ;;  %v940_v49 = vpack.c.bf16 %v543_v45, %v542_v44  ;;  %v544_v51 = vld [vmem:[#allocation2 + $0xc0] sm:$0xff] }
  0x40   : > { %923 = vmatpush1.bf16.msra.mxu0 %v922_v20  ;;  %v216_v50 = vld [vmem:[%s1295_s29 + $0x10] sm:$0xff]  ;;  %v545_v52 = vld [vmem:[#allocation2 + $0xc8] sm:$0xff]  ;;  %v942_v53 = vpack.c.bf16 %v527_v48, %v526_v47  ;;  %v528_v54 = vld [vmem:[#allocation2 + $0x40] sm:$0xff] }
  0x41   : > { %925 = vmatprep.subr.bf16.mxu0 %v924_v21  ;;  %v529_v55 = vld [vmem:[#allocation2 + $0x48] sm:$0xff]  ;;  %v944_v56 = vpack.c.bf16 %v545_v52, %v544_v51  ;;  %v217_v57 = vld [vmem:[%s1295_s29 + $0x18] sm:$0xff]  ;;  %v546_v58 = vld [vmem:[#allocation2 + $0xd0] sm:$0xff] }
  0x42   : > { %969 = vmatpush3.bf16.msra.mxu1 %v934_v39  ;;  %v547_v59 = vld [vmem:[#allocation2 + $0xd8] sm:$0xff]  ;;  %v946_v60 = vpack.c.bf16 %v529_v55, %v528_v54  ;;  %v530_v61 = vld [vmem:[#allocation2 + $0x50] sm:$0xff]  ;;  %v218_v1 = vld [vmem:[%s1295_s29 + $0x20] sm:$0xff] }
  0x43   : > { %962 = vmatprep.subr.bf16.mxu1 %v936_v42  ;;  %v531_v62 = vld [vmem:[#allocation2 + $0x58] sm:$0xff]  ;;  %v948_v63 = vpack.c.bf16 %v547_v59, %v546_v58  ;;  %v548_v2 = vld [vmem:[#allocation2 + $0xe0] sm:$0xff]  ;;  %v549_v3 = vld [vmem:[#allocation2 + $0xe8] sm:$0xff] }
  0x44   : > { %927 = vmatpush1.bf16.msra.mxu0 %v926_v28  ;;  %v950_v4 = vpack.c.bf16 %v531_v62, %v530_v61  ;;  %v532_v5 = vld [vmem:[#allocation2 + $0x60] sm:$0xff]  ;;  %v533_v6 = vld [vmem:[#allocation2 + $0x68] sm:$0xff]  ;;  %v952_v7 = vpack.c.bf16 %v549_v3, %v548_v2  ;;  %v220_v10 = vld [vmem:[%s1295_s29 + $0x30] sm:$0xff] }
  0x45   : > { %929 = vmatprep.subr.bf16.mxu0 %v928_v29  ;;  %v219_v8 = vld [vmem:[%s1295_s29 + $0x28] sm:$0xff]  ;;  %v954_v9 = vpack.c.bf16 %v533_v6, %v532_v5  ;;  %v221_v11 = vld [vmem:[%s1295_s29 + $0x38] sm:$0xff]  ;;  %v222_v12 = vld [vmem:[%s1295_s29 + $0x40] sm:$0xff] }
  0x46   : > { %970 = vmatpush3.bf16.msra.mxu1 %v938_v46  ;;  %v223_v13 = vld [vmem:[%s1295_s29 + $0x48] sm:$0xff]  ;;  %v224_v14 = vld [vmem:[%s1295_s29 + $0x50] sm:$0xff]  ;;  %v225_v15 = vld [vmem:[%s1295_s29 + $0x58] sm:$0xff] }
  0x47   : > { %810 = vmatmul.mubr.msk.f32.vlgmr.msra.gmra.mrb[0].mxu0 %vm246_vm0, %v214_v36  ;;  %963 = vmatprep.subr.bf16.mxu1 %v940_v49  ;;  %v226_v16 = vld [vmem:[%s1295_s29 + $0x60] sm:$0xff]  ;;  %v227_v17 = vld [vmem:[%s1295_s29 + $0x68] sm:$0xff]  ;;  %v228_v18 = vld [vmem:[%s1295_s29 + $0x70] sm:$0xff] }
  0x48   : > { %365 = vmatprep.mubr.f32.mxu0 %v1130_v0  ;;  %931 = vmatpush3.bf16.msra.mxu0 %v930_v32  ;;  %v229_v19 = vld [vmem:[%s1295_s29 + $0x78] sm:$0xff]  ;;  %v550_v20 = vld [vmem:[#allocation2 + $0xf0] sm:$0xff]  ;;  %v457_v26 = vld [vmem:[%s1515_s2 + $0x8] sm:$0xff]  ;;  %s831_s29 = sshll.u32 %s1180_s19, 11  ;;  %s1059_s19 = scalar_lea.vmem %s1467_s23, 2048 }
  0x49   : > { %933 = vmatprep.subr.bf16.mxu0 %v932_v33  ;;  %v551_v21 = vld [vmem:[#allocation2 + $0xf8] sm:$0xff]  ;;  %v534_v23 = vld [vmem:[#allocation2 + $0x70] sm:$0xff]  ;;  %v461_v37 = vld [vmem:[%s1515_s2 + $0x28] sm:$0xff]  ;;  %s1465_s7 = scalar_lea.hbm %s1517_s4, %s831_s29  ;;  %p1060_p6 = scmp.ne.s32.totalorder %s1467_s23, %s1059_s19 }
  0x4a   : > { %971 = vmatpush3.bf16.msra.mxu1 %v942_v53  ;;  %v956_v22 = vpack.c.bf16 %v551_v21, %v550_v20  ;;  %v535_v24 = vld [vmem:[#allocation2 + $0x78] sm:$0xff]  ;;  %v458_v33 = vld [vmem:[%s1515_s2 + $0x10] sm:$0xff]  ;;  %v464_v51 = vld [vmem:[%s1515_s2 + $0x40] sm:$0xff]  ;;  %p1067_p3 = scmp.lt.s32.totalorder %s1065_s11, %s1059_s19 }
  0x4b   : > { %811 = vmatmul.mubr.msk.f32.gmra.mrb[2].mxu0 %vm246_vm0, %v215_v43  ;;  %964 = vmatprep.subr.bf16.mxu1 %v944_v56  ;;  %v958_v25 = vpack.c.bf16 %v535_v24, %v534_v23  ;;  %v459_v31 = vld [vmem:[%s1515_s2 + $0x18] sm:$0xff]  ;;  %v462_v45 = vld [vmem:[%s1515_s2 + $0x30] sm:$0xff]  ;;  %v469_v61 = vld [vmem:[%s1515_s2 + $0x68] sm:$0xff]  ;;  %p1061_p10 = pnand %p1060_p6, %p1528_p9 }
  0x4c   : > { %371 = vmatprep.mubr.f32.mxu0 %v1130_v0  ;;  %935 = vmatpush3.bf16.msra.mxu0 %v934_v39  ;;  %v460_v39 = vld [vmem:[%s1515_s2 + $0x20] sm:$0xff]  ;;  %v463_v43 = vld [vmem:[%s1515_s2 + $0x38] sm:$0xff]  ;;  %v470_v6 = vld [vmem:[%s1515_s2 + $0x70] sm:$0xff]  ;;  %p1068_p4 = por %p1067_p3, %p1066_p2 }
  0x4d   : > { %937 = vmatprep.subr.bf16.mxu0 %v936_v42  ;;  %v467_v55 = vld [vmem:[%s1515_s2 + $0x58] sm:$0xff]  ;;  %v476_v24 = vld [vmem:[%s1515_s2 + $0xa0] sm:$0xff]  ;;  %p1062_p12 = pneg %p1061_p10 }
  0x4e   : > { %972 = vmatpush3.bf16.msra.mxu1 %v946_v60 }
  0x4f   : > { %812 = vmatmul.mubr.msk.f32.gmra.mrb[4].mxu0 %vm246_vm0, %v216_v50  ;;  %965 = vmatprep.subr.bf16.mxu1 %v948_v63  ;;  %p1069_p7 = pnand %p1068_p4, %p1062_p12 }
  0x50   : > { %377 = vmatprep.mubr.f32.mxu0 %v1130_v0  ;;  %939 = vmatpush3.bf16.msra.mxu0 %v938_v46 }
  0x51   : > { %941 = vmatprep.subr.bf16.mxu0 %v940_v49  ;;  %v465_v49 = vld [vmem:[%s1515_s2 + $0x48] sm:$0xff] }
  0x52   : > { %973 = vmatpush3.bf16.msra.mxu1 %v950_v4 }
  0x53   : > { %813 = vmatmul.mubr.msk.f32.gmra.mrb[6].mxu0 %vm246_vm0, %v217_v57  ;;  %966 = vmatprep.subr.bf16.mxu1 %v952_v7  ;;  %v466_v57 = vld [vmem:[%s1515_s2 + $0x50] sm:$0xff] }
  0x54   : > { %383 = vmatprep.mubr.f32.mxu0 %v1130_v0  ;;  %943 = vmatpush3.bf16.msra.mxu0 %v942_v53 }
  0x55   : > { %945 = vmatprep.subr.bf16.mxu0 %v944_v56 }
  0x56   : > { %974 = vmatpush3.bf16.msra.mxu1 %v954_v9 }
  0x57   : > { %814 = vmatmul.mubr.msk.f32.gmra.mrb[8].mxu0 %vm246_vm0, %v218_v1  ;;  %967 = vmatprep.subr.bf16.mxu1 %v956_v22 }
  0x58   : > { %389 = vmatprep.mubr.f32.mxu0 %v1130_v0  ;;  %947 = vmatpush3.bf16.msra.mxu0 %v946_v60 }
  0x59   : > { %949 = vmatprep.subr.bf16.mxu0 %v948_v63  ;;  %v468_v63 = vld [vmem:[%s1515_s2 + $0x60] sm:$0xff] }
  0x5a   : > { %975 = vmatpush3.bf16.msra.mxu1 %v958_v25 }
  0x5b   : > { %815 = vmatmul.mubr.msk.f32.gmra.mrb[10].mxu0 %vm246_vm0, %v219_v8 }
  0x5c   : > { %395 = vmatprep.mubr.f32.mxu0 %v1130_v0  ;;  %951 = vmatpush3.bf16.msra.mxu0 %v950_v4  ;;  %v471_v4 = vld [vmem:[%s1515_s2 + $0x78] sm:$0xff] }
  0x5d   : > { %953 = vmatprep.subr.bf16.mxu0 %v952_v7 }
  0x5f   : > { %816 = vmatmul.mubr.msk.f32.gmra.mrb[12].mxu0 %vm246_vm0, %v220_v10  ;;  %v473_v10 = vld [vmem:[%s1515_s2 + $0x88] sm:$0xff] }
  0x60   : > { %401 = vmatprep.mubr.f32.mxu0 %v1130_v0  ;;  %955 = vmatpush3.bf16.msra.mxu0 %v954_v9 }
  0x61   : > { %957 = vmatprep.subr.bf16.mxu0 %v956_v22  ;;  %v477_v22 = vld [vmem:[%s1515_s2 + $0xa8] sm:$0xff] }
  0x63   : > { %817 = vmatmul.mubr.msk.f32.gmra.mrb[14].mxu0 %vm246_vm0, %v221_v11 }
  0x64   : > { %407 = vmatprep.mubr.f32.mxu0 %v1130_v0  ;;  %959 = vmatpush3.bf16.msra.mxu0 %v958_v25 }
  0x67   : > { %818 = vmatmul.mubr.msk.f32.gmra.mrb[16].mxu0 %vm246_vm0, %v222_v12  ;;  %v472_v12 = vld [vmem:[%s1515_s2 + $0x80] sm:$0xff] }
  0x68   : > { %413 = vmatprep.mubr.f32.mxu0 %v1130_v0 }
  0x6b   : > { %819 = vmatmul.mubr.msk.f32.gmra.mrb[18].mxu0 %vm246_vm0, %v223_v13 }
  0x6c   : > { %419 = vmatprep.mubr.f32.mxu0 %v1130_v0 }
  0x6f   : > { %820 = vmatmul.mubr.msk.f32.gmra.mrb[20].mxu0 %vm246_vm0, %v224_v14 }
  0x70   : > { %425 = vmatprep.mubr.f32.mxu0 %v1130_v0 }
  0x73   : > { %821 = vmatmul.mubr.msk.f32.gmra.mrb[22].mxu0 %vm246_vm0, %v225_v15 }
  0x74   : > { %431 = vmatprep.mubr.f32.mxu0 %v1130_v0 }
  0x77   : > { %822 = vmatmul.mubr.msk.f32.gmra.mrb[24].mxu0 %vm246_vm0, %v226_v16  ;;  %v475_v16 = vld [vmem:[%s1515_s2 + $0x98] sm:$0xff] }
  0x78   : > { %437 = vmatprep.mubr.f32.mxu0 %v1130_v0 }
  0x7b   : > { %823 = vmatmul.mubr.msk.f32.gmra.mrb[26].mxu0 %vm246_vm0, %v227_v17 }
  0x7c   : > { %443 = vmatprep.mubr.f32.mxu0 %v1130_v0 }
  0x7f   : > { %824 = vmatmul.mubr.msk.f32.gmra.mrb[28].mxu0 %vm246_vm0, %v228_v18  ;;  %v474_v18 = vld [vmem:[%s1515_s2 + $0x90] sm:$0xff] }
  0x80   : > { %449 = vmatprep.mubr.f32.mxu0 %v1130_v0  ;;  %v456_v0 = vld [vmem:[%s1515_s2] sm:$0xff] }
  0x83   : > { %825 = vmatmul.mubr.msk.f32.gmra.mrb[30].mxu0 %vm246_vm0, %v229_v19 }
 0x11a   : > { %v361_v27 = vpop.f32.mrb[0].mxu0 }
 0x11b   : > { %v363_v28 = vpop.f32.mrb[1].mxu0  ;;  %v488_v30 = vmul.f32 %v456_v0, %v361_v27  ;;  %v479_v0 = vld [vmem:[%s1515_s2 + $0xb8] sm:$0xff] }
 0x11c   : > { %v489_v29 = vmul.f32 %v457_v26, %v363_v28 }
 0x11e   : > { %v367_v32 = vpop.f32.mrb[2].mxu0  ;;  %616 = vmatprep.mubr.f32.mxu0 %v489_v29  ;;  %v478_v29 = vld [vmem:[%s1515_s2 + $0xb0] sm:$0xff] }
 0x11f   : > { %v369_v34 = vpop.f32.mrb[3].mxu0  ;;  %617 = vmatmul.mubr.f32.vlgmr.msra.gmra.mrb[32].mxu0 %v488_v30  ;;  %v490_v36 = vmul.f32 %v458_v33, %v367_v32  ;;  %v481_v33 = vld [vmem:[%s1515_s2 + $0xc8] sm:$0xff] }
 0x120   : > { %v491_v35 = vmul.f32 %v459_v31, %v369_v34 }
 0x122   : > { %v373_v38 = vpop.f32.mrb[4].mxu0  ;;  %621 = vmatprep.mubr.f32.mxu0 %v491_v35  ;;  %v480_v35 = vld [vmem:[%s1515_s2 + $0xc0] sm:$0xff] }
 0x123   : > { %v375_v40 = vpop.f32.mrb[5].mxu0  ;;  %622 = vmatmul.mubr.f32.gmra.mrb[34].mxu0 %v490_v36  ;;  %v492_v42 = vmul.f32 %v460_v39, %v373_v38  ;;  %v483_v39 = vld [vmem:[%s1515_s2 + $0xd8] sm:$0xff] }
 0x124   : > { %v493_v41 = vmul.f32 %v461_v37, %v375_v40 }
 0x126   : > { %v379_v44 = vpop.f32.mrb[6].mxu0  ;;  %626 = vmatprep.mubr.f32.mxu1 %v493_v41  ;;  %v482_v41 = vld [vmem:[%s1515_s2 + $0xd0] sm:$0xff] }
 0x127   : > { %v381_v46 = vpop.f32.mrb[7].mxu0  ;;  %627 = vmatmul.mubr.f32.vlgmr.msra.gmra.mrb[0].mxu1 %v492_v42  ;;  %v494_v48 = vmul.f32 %v462_v45, %v379_v44  ;;  %v485_v45 = vld [vmem:[%s1515_s2 + $0xe8] sm:$0xff] }
 0x128   : > { %v495_v47 = vmul.f32 %v463_v43, %v381_v46 }
 0x12a   : > { %v385_v50 = vpop.f32.mrb[8].mxu0  ;;  %631 = vmatprep.mubr.f32.mxu1 %v495_v47  ;;  %v484_v47 = vld [vmem:[%s1515_s2 + $0xe0] sm:$0xff] }
 0x12b   : > { %v387_v52 = vpop.f32.mrb[9].mxu0  ;;  %632 = vmatmul.mubr.f32.gmra.mrb[2].mxu1 %v494_v48  ;;  %v496_v54 = vmul.f32 %v464_v51, %v385_v50  ;;  %v487_v51 = vld [vmem:[%s1515_s2 + $0xf8] sm:$0xff] }
 0x12c   : > { %v497_v53 = vmul.f32 %v465_v49, %v387_v52 }
 0x12e   : > { %v391_v56 = vpop.f32.mrb[10].mxu0  ;;  %636 = vmatprep.mubr.f32.mxu1 %v497_v53  ;;  %v486_v53 = vld [vmem:[%s1515_s2 + $0xf0] sm:$0xff] }
 0x12f   : > { %v393_v58 = vpop.f32.mrb[11].mxu0  ;;  %637 = vmatmul.mubr.f32.gmra.mrb[4].mxu1 %v496_v54  ;;  %v498_v60 = vmul.f32 %v466_v57, %v391_v56 }
 0x130   : > { %v499_v59 = vmul.f32 %v467_v55, %v393_v58 }
 0x132   : > { %v397_v62 = vpop.f32.mrb[12].mxu0  ;;  %641 = vmatprep.mubr.f32.mxu1 %v499_v59 }
 0x133   : > { %v399_v1 = vpop.f32.mrb[13].mxu0  ;;  %642 = vmatmul.mubr.f32.gmra.mrb[6].mxu1 %v498_v60  ;;  %v500_v3 = vmul.f32 %v468_v63, %v397_v62 }
 0x134   : > { %v501_v2 = vmul.f32 %v469_v61, %v399_v1 }
 0x136   : > { %v403_v5 = vpop.f32.mrb[14].mxu0  ;;  %646 = vmatprep.mubr.f32.mxu1 %v501_v2 }
 0x137   : > { %v405_v7 = vpop.f32.mrb[15].mxu0  ;;  %647 = vmatmul.mubr.f32.gmra.mrb[8].mxu1 %v500_v3  ;;  %v502_v9 = vmul.f32 %v470_v6, %v403_v5 }
 0x138   : > { %v503_v8 = vmul.f32 %v471_v4, %v405_v7 }
 0x13a   : > { %v409_v11 = vpop.f32.mrb[16].mxu0  ;;  %651 = vmatprep.mubr.f32.mxu1 %v503_v8 }
 0x13b   : > { %v411_v13 = vpop.f32.mrb[17].mxu0  ;;  %652 = vmatmul.mubr.f32.gmra.mrb[10].mxu1 %v502_v9  ;;  %v504_v15 = vmul.f32 %v472_v12, %v409_v11 }
 0x13c   : > { %v505_v14 = vmul.f32 %v473_v10, %v411_v13 }
 0x13e   : > { %v415_v17 = vpop.f32.mrb[18].mxu0  ;;  %656 = vmatprep.mubr.f32.mxu1 %v505_v14 }
 0x13f   : > { %v417_v19 = vpop.f32.mrb[19].mxu0  ;;  %657 = vmatmul.mubr.f32.gmra.mrb[12].mxu1 %v504_v15  ;;  %v506_v21 = vmul.f32 %v474_v18, %v415_v17 }
 0x140   : > { %v507_v20 = vmul.f32 %v475_v16, %v417_v19 }
 0x142   : > { %v421_v23 = vpop.f32.mrb[20].mxu0  ;;  %661 = vmatprep.mubr.f32.mxu1 %v507_v20 }
 0x143   : > { %v423_v25 = vpop.f32.mrb[21].mxu0  ;;  %662 = vmatmul.mubr.f32.gmra.mrb[14].mxu1 %v506_v21  ;;  %v508_v27 = vmul.f32 %v476_v24, %v421_v23 }
 0x144   : > { %v509_v26 = vmul.f32 %v477_v22, %v423_v25 }
 0x146   : > { %v427_v28 = vpop.f32.mrb[22].mxu0  ;;  %666 = vmatprep.mubr.f32.mxu1 %v509_v26 }
 0x147   : > { %v429_v30 = vpop.f32.mrb[23].mxu0  ;;  %667 = vmatmul.mubr.f32.gmra.mrb[16].mxu1 %v508_v27  ;;  %v510_v32 = vmul.f32 %v478_v29, %v427_v28 }
 0x148   : > { %v511_v31 = vmul.f32 %v479_v0, %v429_v30 }
 0x14a   : > { %v433_v34 = vpop.f32.mrb[24].mxu0  ;;  %671 = vmatprep.mubr.f32.mxu1 %v511_v31 }
 0x14b   : > { %v435_v36 = vpop.f32.mrb[25].mxu0  ;;  %672 = vmatmul.mubr.f32.gmra.mrb[18].mxu1 %v510_v32  ;;  %v512_v38 = vmul.f32 %v480_v35, %v433_v34 }
 0x14c   : > { %v513_v37 = vmul.f32 %v481_v33, %v435_v36 }
 0x14e   : > { %v439_v40 = vpop.f32.mrb[26].mxu0  ;;  %676 = vmatprep.mubr.f32.mxu1 %v513_v37 }
 0x14f   : > { %v441_v42 = vpop.f32.mrb[27].mxu0  ;;  %677 = vmatmul.mubr.f32.gmra.mrb[20].mxu1 %v512_v38  ;;  %v514_v44 = vmul.f32 %v482_v41, %v439_v40 }
 0x150   : > { %v515_v43 = vmul.f32 %v483_v39, %v441_v42 }
 0x152   : > { %v445_v46 = vpop.f32.mrb[28].mxu0  ;;  %681 = vmatprep.mubr.f32.mxu1 %v515_v43 }
 0x153   : > { %v447_v48 = vpop.f32.mrb[29].mxu0  ;;  %682 = vmatmul.mubr.f32.gmra.mrb[22].mxu1 %v514_v44  ;;  %v516_v50 = vmul.f32 %v484_v47, %v445_v46 }
 0x154   : > { %v517_v49 = vmul.f32 %v485_v45, %v447_v48 }
 0x156   : > { %v451_v52 = vpop.f32.mrb[30].mxu0  ;;  %686 = vmatprep.mubr.f32.mxu1 %v517_v49 }
 0x157   : > { %v453_v54 = vpop.f32.mrb[31].mxu0  ;;  %687 = vmatmul.mubr.f32.gmra.mrb[24].mxu1 %v516_v50  ;;  %v518_v56 = vmul.f32 %v486_v53, %v451_v52 }
 0x158   : > { %v519_v55 = vmul.f32 %v487_v51, %v453_v54 }
 0x15a   : > { %691 = vmatprep.mubr.f32.mxu1 %v519_v55 }
 0x15b   : > { %692 = vmatmul.mubr.f32.gmra.mrb[26].mxu1 %v518_v56 }
 0x1f2   : > { %v864_v57 = vpop.f32.mrb[32].mxu0 }
 0x1f3   : > { %v865_v58 = vpop.f32.mrb[33].mxu0 }
 0x1f4   : > { %v866_v59 = vadd.f32 %v865_v58, %v864_v57 }
 0x1f6   : > { %697 = vst [vmem:[%s1443_s5] sm:$0xff] %v866_v59  ;;  %v867_v60 = vpop.f32.mrb[34].mxu0 }
 0x1f7   : > { %v868_v61 = vpop.f32.mrb[35].mxu0 }
 0x1f8   : > { %v869_v62 = vadd.f32 %v868_v61, %v867_v60 }
 0x1fa   : > { %698 = vst [vmem:[%s1443_s5 + $0x8] sm:$0xff] %v869_v62  ;;  %v870_v63 = vpop.f32.mrb[0].mxu1 }
 0x1fb   : > { %v871_v1 = vpop.f32.mrb[1].mxu1 }
 0x1fc   : > { %v872_v2 = vadd.f32 %v871_v1, %v870_v63 }
 0x1fe   : > { %699 = vst [vmem:[%s1443_s5 + $0x10] sm:$0xff] %v872_v2  ;;  %v873_v3 = vpop.f32.mrb[2].mxu1 }
 0x1ff   : > { %v874_v4 = vpop.f32.mrb[3].mxu1 }
 0x200   : > { %v875_v5 = vadd.f32 %v874_v4, %v873_v3 }
 0x202   : > { %700 = vst [vmem:[%s1443_s5 + $0x18] sm:$0xff] %v875_v5  ;;  %v876_v6 = vpop.f32.mrb[4].mxu1 }
 0x203   : > { %v877_v7 = vpop.f32.mrb[5].mxu1 }
 0x204   : > { %v878_v8 = vadd.f32 %v877_v7, %v876_v6 }
 0x206   : > { %701 = vst [vmem:[%s1443_s5 + $0x20] sm:$0xff] %v878_v8  ;;  %v879_v9 = vpop.f32.mrb[6].mxu1 }
 0x207   : > { %v880_v10 = vpop.f32.mrb[7].mxu1 }
 0x208   : > { %v881_v11 = vadd.f32 %v880_v10, %v879_v9 }
 0x20a   : > { %702 = vst [vmem:[%s1443_s5 + $0x28] sm:$0xff] %v881_v11  ;;  %v882_v12 = vpop.f32.mrb[8].mxu1 }
 0x20b   : > { %v883_v13 = vpop.f32.mrb[9].mxu1 }
 0x20c   : > { %v884_v14 = vadd.f32 %v883_v13, %v882_v12 }
 0x20e   : > { %703 = vst [vmem:[%s1443_s5 + $0x30] sm:$0xff] %v884_v14  ;;  %v885_v15 = vpop.f32.mrb[10].mxu1 }
 0x20f   : > { %v886_v16 = vpop.f32.mrb[11].mxu1 }
 0x210   : > { %v887_v17 = vadd.f32 %v886_v16, %v885_v15 }
 0x212   : > { %704 = vst [vmem:[%s1443_s5 + $0x38] sm:$0xff] %v887_v17  ;;  %v888_v18 = vpop.f32.mrb[12].mxu1 }
 0x213   : > { %v889_v19 = vpop.f32.mrb[13].mxu1 }
 0x214   : > { %v890_v20 = vadd.f32 %v889_v19, %v888_v18 }
 0x216   : > { %705 = vst [vmem:[%s1443_s5 + $0x40] sm:$0xff] %v890_v20  ;;  %v891_v21 = vpop.f32.mrb[14].mxu1 }
 0x217   : > { %v892_v22 = vpop.f32.mrb[15].mxu1 }
 0x218   : > { %v893_v23 = vadd.f32 %v892_v22, %v891_v21 }
 0x21a   : > { %706 = vst [vmem:[%s1443_s5 + $0x48] sm:$0xff] %v893_v23  ;;  %v894_v24 = vpop.f32.mrb[16].mxu1 }
 0x21b   : > { %v895_v25 = vpop.f32.mrb[17].mxu1 }
 0x21c   : > { %v896_v26 = vadd.f32 %v895_v25, %v894_v24 }
 0x21e   : > { %707 = vst [vmem:[%s1443_s5 + $0x50] sm:$0xff] %v896_v26  ;;  %v897_v27 = vpop.f32.mrb[18].mxu1 }
 0x21f   : > { %v898_v0 = vpop.f32.mrb[19].mxu1 }
 0x220   : > { %v899_v28 = vadd.f32 %v898_v0, %v897_v27 }
 0x222   : > { %708 = vst [vmem:[%s1443_s5 + $0x58] sm:$0xff] %v899_v28  ;;  %v900_v29 = vpop.f32.mrb[20].mxu1 }
 0x223   : > { %v901_v30 = vpop.f32.mrb[21].mxu1 }
 0x224   : > { %v902_v31 = vadd.f32 %v901_v30, %v900_v29 }
 0x226   : > { %709 = vst [vmem:[%s1443_s5 + $0x60] sm:$0xff] %v902_v31  ;;  %v903_v32 = vpop.f32.mrb[22].mxu1 }
 0x227   : > { %v904_v33 = vpop.f32.mrb[23].mxu1 }
 0x228   : > { %v905_v34 = vadd.f32 %v904_v33, %v903_v32 }
 0x22a   : > { %710 = vst [vmem:[%s1443_s5 + $0x68] sm:$0xff] %v905_v34  ;;  %v906_v35 = vpop.f32.mrb[24].mxu1 }
 0x22b   : > { %v907_v36 = vpop.f32.mrb[25].mxu1 }
 0x22c   : > { %v908_v37 = vadd.f32 %v907_v36, %v906_v35 }
 0x22e   : > { %711 = vst [vmem:[%s1443_s5 + $0x70] sm:$0xff] %v908_v37  ;;  %v909_v38 = vpop.f32.mrb[26].mxu1 }
 0x22f   : > { %v910_v39 = vpop.f32.mrb[27].mxu1 }
 0x230   : > { %v911_v40 = vadd.f32 %v910_v39, %v909_v38 }
 0x232   : > { %712 = vst [vmem:[%s1443_s5 + $0x78] sm:$0xff] %v911_v40 }
 0x233   : > { %1072 = shalt.err (!%p1069_p7)
}
 0x234   : > { %s1073_s12 = scalar_lea.hbm %s1465_s7, 2048  ;;  %s1077_s20 = scalar_lea.hbm %s1517_s4, 4096 }
 0x235   : > { %p1074_p8 = scmp.ne.s32.totalorder %s1465_s7, %s1073_s12  ;;  %p1078_p1 = scmp.lt.u32.totalorder %s1465_s7, %s1517_s4 }
 0x236   : > { %p1079_p0 = scmp.lt.u32.totalorder %s1077_s20, %s1073_s12  ;;  %p1081_p6 = scmp.lt.u32.totalorder %s1073_s12, %s1465_s7 }
 0x237   : > { %p1075_p11 = pnand %p1074_p8, %p1528_p9 }
 0x238   : > { %p1080_p5 = por %p1079_p0, %p1078_p1 }
 0x239   : > { %p1076_p13 = pneg %p1075_p11 }
 0x23a   : > { %p1082_p10 = por %p1081_p6, %p1080_p5 }
 0x23c   : > { %p1083_p12 = pnand %p1082_p10, %p1076_p13 }
 0x23e   : > { %1086 = shalt.err (!%p1083_p12)
}
 0x23f   : > { %s1132_s30 = smov 128   ;;  %s1133_s5 = smov 8  }
 0x240   : > { %980 = dma.vmem_to_hbm [thread:$0]  (%p1528_p9), %s1467_s23, 2048, %s1465_s7, %s1472_s8, %s1132_s30, %s1132_s30, %s1133_s5  }
 0x241 PF: > { %p992_p2 = scmp.ge.s32.totalorder %s1125_s18, 2  ;;  %s742_s29 = sand.u32 1, %s1113_s15  }
 0x242   : > { %p1529_p3 = scmp.ne.s32.totalorder %s1522_s26, 0  ;;  %s743_s27 = scalar_lea.sflag [#allocation4], %s742_s29 }
 0x244   : > { %p987_p4 = pnand %p992_p2, %p1529_p3 }
 0x246   : > { %1108 = dma.done.wait (!%p987_p4), %s743_s27, 2048  }
 0x247   : > { %1110 = vsyncadd (!%p987_p4), %s743_s27, 4294965248  ;;  %p15_p7 = scmp.ge.s32.totalorder %s1184_s21, 4   ;;  %s1530_s15 = smov %s1117_s16 }
 0x248   : > { %s1531_s16 = smov %s1121_s17  ;;  %s1532_s17 = smov %s1195_s24 }
 0x249   : > { %s1533_s18 = smov %s1184_s21  ;;  %17 = sbr.rel (!%p15_p7) target bundleno = 4 (0x4), region = 76 }
 0x250   :  { %748 = vsyncpa [#allocation3], 1 }
 0x251   :  { %750 = vsyncpa [#allocation3 + $0x1], 1 }
 0x252   :  { %751 = vsyncpa [#allocation4], 1 }
 0x253   :  { %753 = vsyncpa [#allocation4 + $0x1], 1 }

</bundles_post_ra>
